<compile_context>
chip_gen: v6e
topology: v6e:2x2x1
jax: 0.10.0
libtpu: 0.0.40
codegen_flags: <defaults>
</compile_context>

<pallas_src>
import math
import numpy as np
import jax
import jax.numpy as jnp
from jax.experimental import pallas as pl
from jax.experimental.pallas import tpu as pltpu


# ----------------------------------------------------------------------------- kernel


def _gf_kernel(x_ref, fas_ref, kbs_ref, jc_ref, js_ref, lfin_ref,
               wr_ref, wi_ref, o_ref):
    a = fas_ref.shape[1]          # H size (= H freq count)
    dpc = jc_ref.shape[0]         # Dp * C  (lane width of the frequency domain)

    x = x_ref[0].astype(jnp.bfloat16)                                   # (a, b*C)

    # --- forward complex DFT over H (rows); [cos; -sin] stacked on rows -> 1 matmul
    v = jnp.dot(fas_ref[...], x, preferred_element_type=jnp.float32)    # (2a, b*C)

    # --- forward rfft over W (lanes, DFT (x) I_C); [cos | -sin] stacked on lanes -> 1 matmul
    u = jnp.dot(v.astype(jnp.bfloat16), kbs_ref[...],
                preferred_element_type=jnp.float32)                     # (2a, 2*Dp*C)

    # recombine the 2x2 block structure into the complex spectrum (free aligned slices)
    xr = u[:a, :dpc] - u[a:, dpc:]                                      # (a, Dp*C)
    xi = u[a:, :dpc] + u[:a, dpc:]

    # --- learned global filter: complex pointwise multiply, kept in f32 on the VPU
    wr = wr_ref[...]
    wi = wi_ref[...]
    yr = xr * wr - xi * wi
    yi = xr * wi + xi * wr

    # --- inverse rfft over W: Hermitian fold + ortho 1/(a*b) folded into jc/js
    r = jnp.concatenate([yr, yi], axis=0).astype(jnp.bfloat16)          # (2a, Dp*C)
    rc = jnp.dot(r, jc_ref[...], preferred_element_type=jnp.float32)    # (2a, b*C)
    rs = jnp.dot(r, js_ref[...], preferred_element_type=jnp.float32)    # (2a, b*C)
    p = rc[:a] - rs[a:]
    q = rs[:a] + rc[a:]

    # --- inverse DFT over H, real part only; [cos | -sin] stacked on lanes -> 1 matmul
    pq = jnp.concatenate([p, q], axis=0).astype(jnp.bfloat16)           # (2a, b*C)
    o_ref[0] = jnp.dot(lfin_ref[...], pq,
                       preferred_element_type=jnp.float32)              # (a, b*C)


# --------------------------------------------------------------------- host-side matrices


def _dft_matrices(a, b, C, Dp, dtype=jnp.bfloat16):
    """DFT matrices in the (H rows, W(x)C lanes) layout used by the kernel."""
    D = b // 2 + 1
    h = np.arange(a)
    w = np.arange(b)
    f = np.arange(Dp)
    eye_c = np.eye(C)

    # forward DFT over H: V = FaS @ x -> rows [0:a)=Re, [a:2a)=Im  (e^{-i})
    ang_a = 2.0 * np.pi * np.outer(h, h) / a                 # [k, h]
    fas = np.concatenate([np.cos(ang_a), -np.sin(ang_a)], axis=0)        # (2a, a)

    # forward rfft over W as a right matmul on the fused (w,c) lane axis (DFT (x) I_C),
    # cos | -sin stacked along output lanes; padded freqs f >= D are zero columns.
    mask = (f < D).astype(np.float64)
    ang_b = 2.0 * np.pi * np.outer(w, f) / b                 # [w, f]
    kc = np.cos(ang_b) * mask
    ks = -np.sin(ang_b) * mask
    kbs = np.concatenate([np.kron(kc, eye_c), np.kron(ks, eye_c)], axis=1)  # (b*C, 2*Dp*C)

    # inverse rfft over W: Hermitian fold weights c_f and ortho 1/(a*b) folded in.
    cf = np.where((f == 0) | ((b % 2 == 0) & (f == b // 2)), 1.0, 2.0) * mask
    scale = 1.0 / float(a * b)
    ang_ib = 2.0 * np.pi * np.outer(f, w) / b                # [f, w]
    jc = np.kron(cf[:, None] * np.cos(ang_ib) * scale, eye_c)            # (Dp*C, b*C)
    js = np.kron(cf[:, None] * np.sin(ang_ib) * scale, eye_c)            # (Dp*C, b*C)

    # inverse DFT over H (real part only): y = [cos | -sin] @ [P; Q]
    ang_inv = 2.0 * np.pi * np.outer(h, h) / a               # [n, k]
    lfin = np.concatenate([np.cos(ang_inv), -np.sin(ang_inv)], axis=1)   # (a, 2a)

    cast = lambda m: jnp.asarray(m, dtype=dtype)
    return cast(fas), cast(kbs), cast(jc), cast(js), cast(lfin)


# -------------------------------------------------------------------------------- wrapper


def global_filter(x, complex_weight):
    """x: (B, N, C) float32;  complex_weight: (size, size, dim, 2) float32."""
    B, N, C = x.shape
    a = b = int(math.sqrt(N))
    assert a * b == N, "GlobalFilter assumes a square token grid (N = a*a)"
    D = b // 2 + 1
    assert complex_weight.shape[0] == a and complex_weight.shape[1] >= D
    assert complex_weight.shape[2] == C

    # pad the rfft frequency axis so Dp*C is a multiple of 128 (lane-dense, free slices)
    step = 128 // math.gcd(C, 128)
    Dp = ((D + step - 1) // step) * step
    bC = b * C
    dpc = Dp * C

    # free reshape: (B, N, C) -> (B, a, b*C)   (rows = H, lanes = fused (w, c))
    x2 = x.reshape(B, a, bC).astype(jnp.float32)

    fas, kbs, jc, js, lfin = _dft_matrices(a, b, C, Dp)

    # learned filter in the (k rows, (f,c) lanes) layout, zero-padded to Dp, kept f32
    wgt = complex_weight[:, :D, :, :].astype(jnp.float32)                 # (a, D, C, 2)
    pad = ((0, 0), (0, (Dp - D) * C))
    wr2 = jnp.pad(wgt[..., 0].reshape(a, D * C), pad)                     # (a, Dp*C)
    wi2 = jnp.pad(wgt[..., 1].reshape(a, D * C), pad)

    const = lambda shape: pl.BlockSpec(shape, lambda i: (0, 0))

    out = pl.pallas_call(
        _gf_kernel,
        out_shape=jax.ShapeDtypeStruct((B, a, bC), jnp.float32),
        grid=(B,),
        in_specs=[
            pl.BlockSpec((1, a, bC), lambda i: (i, 0, 0)),   # x  (one image per step)
            const((2 * a, a)),       # fas
            const((bC, 2 * dpc)),    # kbs
            const((dpc, bC)),        # jc
            const((dpc, bC)),        # js
            const((a, 2 * a)),       # lfin
            const((a, dpc)),         # wr
            const((a, dpc)),         # wi
        ],
        out_specs=pl.BlockSpec((1, a, bC), lambda i: (i, 0, 0)),
        compiler_params=pltpu.CompilerParams(
            dimension_semantics=("parallel",)),
    )(x2, fas, kbs, jc, js, lfin, wr2, wi2)

    # free reshape back to the token layout
    return out.reshape(B, N, C)


# ------------------------------------------------------------------------------ reference


def _numpy_reference(x_np, w_np):
    B, N, C = x_np.shape
    a = b = int(math.sqrt(N))
    D = b // 2 + 1
    x4 = x_np.reshape(B, a, b, C).astype(np.float32)
    X = np.fft.rfft2(x4, axes=(1, 2), norm='ortho')             # (B, a, D, C)
    wc = w_np[:, :D, :, 0] + 1j * w_np[:, :D, :, 1]             # (a, D, C)
    X = X * wc[None]
    y = np.fft.irfft2(X, s=(a, b), axes=(1, 2), norm='ortho')   # (B, a, b, C)
    return y.reshape(B, N, C)


if __name__ == "__main__":
    # GlobalFilter(dim=4, size=16) applied to tokens of a 16x16 grid
    B, C = 2, 4
    size = 16
    N = size * size

    key = jax.random.PRNGKey(0)
    kx, kw = jax.random.split(key)
    x = jax.random.normal(kx, (B, N, C), dtype=jnp.float32)
    complex_weight = (jax.random.normal(kw, (size, size, C, 2), dtype=jnp.float32)
                      * 0.02)

    y = global_filter(x, complex_weight)
    y = jax.block_until_ready(y)

    y_ref = _numpy_reference(np.asarray(x), np.asarray(complex_weight))
    # bf16 matmul inputs with f32 accumulation: slightly looser tolerance than pure f32
    np.testing.assert_allclose(np.asarray(y), y_ref, atol=2e-3, rtol=2e-2)

    print("KERNEL_OK")
</pallas_src>

<mosaic_0001>
module attributes {stable_mosaic.version = 11 : i64} {
  func.func @_gf_kernel(%arg0: i32, %arg1: memref<1x16x64xf32, #tpu.memory_space<vmem>>, %arg2: memref<32x16xbf16, #tpu.memory_space<vmem>>, %arg3: memref<64x256xbf16, #tpu.memory_space<vmem>>, %arg4: memref<128x64xbf16, #tpu.memory_space<vmem>>, %arg5: memref<128x64xbf16, #tpu.memory_space<vmem>>, %arg6: memref<16x32xbf16, #tpu.memory_space<vmem>>, %arg7: memref<16x128xf32, #tpu.memory_space<vmem>>, %arg8: memref<16x128xf32, #tpu.memory_space<vmem>>, %arg9: memref<1x16x64xf32, #tpu.memory_space<vmem>>) attributes {dimension_semantics = [#tpu.dimension_semantics<parallel>], iteration_bounds = array<i64: 2>, scalar_prefetch = 0 : i64, scratch_operands = 0 : i64, tpu.core_type = #tpu.core_type<tc>, window_params = [{transform_indices = @transform_0, window_bounds = array<i64: 1, 16, 64>}, {pipeline_mode = #tpu.pipeline_mode<synchronous>, transform_indices = @transform_1, window_bounds = array<i64: 32, 16>}, {pipeline_mode = #tpu.pipeline_mode<synchronous>, transform_indices = @transform_2, window_bounds = array<i64: 64, 256>}, {pipeline_mode = #tpu.pipeline_mode<synchronous>, transform_indices = @transform_3, window_bounds = array<i64: 128, 64>}, {pipeline_mode = #tpu.pipeline_mode<synchronous>, transform_indices = @transform_4, window_bounds = array<i64: 128, 64>}, {pipeline_mode = #tpu.pipeline_mode<synchronous>, transform_indices = @transform_5, window_bounds = array<i64: 16, 32>}, {pipeline_mode = #tpu.pipeline_mode<synchronous>, transform_indices = @transform_6, window_bounds = array<i64: 16, 128>}, {pipeline_mode = #tpu.pipeline_mode<synchronous>, transform_indices = @transform_7, window_bounds = array<i64: 16, 128>}, {transform_indices = @transform_8, window_bounds = array<i64: 1, 16, 64>}]} {
    %c0 = arith.constant 0 : index
    %c0_0 = arith.constant 0 : index
    %c0_1 = arith.constant 0 : index
    %0 = vector.load %arg1[%c0, %c0_0, %c0_1] : memref<1x16x64xf32, #tpu.memory_space<vmem>>, vector<1x16x64xf32>
    %1 = vector.shape_cast %0 : vector<1x16x64xf32> to vector<16x64xf32>
    %2 = arith.truncf %1 : vector<16x64xf32> to vector<16x64xbf16>
    %c0_2 = arith.constant 0 : index
    %c0_3 = arith.constant 0 : index
    %3 = vector.load %arg2[%c0_2, %c0_3] : memref<32x16xbf16, #tpu.memory_space<vmem>>, vector<32x16xbf16>
    %cst = arith.constant dense<0.000000e+00> : vector<32x64xf32>
    %4 = tpu.matmul %3, %2, %cst {dimension_numbers = #tpu.dot_dimension_numbers<[1], [0], [0], [1], [0, 0, 1, 1], [], []>} : vector<32x16xbf16>, vector<16x64xbf16>, vector<32x64xf32> -> vector<32x64xf32>
    %5 = arith.truncf %4 : vector<32x64xf32> to vector<32x64xbf16>
    %c0_4 = arith.constant 0 : index
    %c0_5 = arith.constant 0 : index
    %6 = vector.load %arg3[%c0_4, %c0_5] : memref<64x256xbf16, #tpu.memory_space<vmem>>, vector<64x256xbf16>
    %cst_6 = arith.constant dense<0.000000e+00> : vector<32x256xf32>
    %7 = tpu.matmul %5, %6, %cst_6 {dimension_numbers = #tpu.dot_dimension_numbers<[1], [0], [0], [1], [0, 0, 1, 1], [], []>} : vector<32x64xbf16>, vector<64x256xbf16>, vector<32x256xf32> -> vector<32x256xf32>
    %8 = vector.extract_strided_slice %7 {offsets = [0, 0], sizes = [16, 128], strides = [1, 1]} : vector<32x256xf32> to vector<16x128xf32>
    %9 = vector.extract_strided_slice %7 {offsets = [16, 128], sizes = [16, 128], strides = [1, 1]} : vector<32x256xf32> to vector<16x128xf32>
    %10 = arith.subf %8, %9 : vector<16x128xf32>
    %11 = vector.extract_strided_slice %7 {offsets = [16, 0], sizes = [16, 128], strides = [1, 1]} : vector<32x256xf32> to vector<16x128xf32>
    %12 = vector.extract_strided_slice %7 {offsets = [0, 128], sizes = [16, 128], strides = [1, 1]} : vector<32x256xf32> to vector<16x128xf32>
    %13 = arith.addf %11, %12 : vector<16x128xf32>
    %c0_7 = arith.constant 0 : index
    %c0_8 = arith.constant 0 : index
    %14 = vector.load %arg7[%c0_7, %c0_8] : memref<16x128xf32, #tpu.memory_space<vmem>>, vector<16x128xf32>
    %c0_9 = arith.constant 0 : index
    %c0_10 = arith.constant 0 : index
    %15 = vector.load %arg8[%c0_9, %c0_10] : memref<16x128xf32, #tpu.memory_space<vmem>>, vector<16x128xf32>
    %16 = arith.mulf %10, %14 : vector<16x128xf32>
    %17 = arith.mulf %13, %15 : vector<16x128xf32>
    %18 = arith.subf %16, %17 : vector<16x128xf32>
    %19 = arith.mulf %10, %15 : vector<16x128xf32>
    %20 = arith.mulf %13, %14 : vector<16x128xf32>
    %21 = arith.addf %19, %20 : vector<16x128xf32>
    %22 = tpu.concatenate %18, %21 in 0 : vector<16x128xf32>, vector<16x128xf32> -> vector<32x128xf32>
    %23 = arith.truncf %22 : vector<32x128xf32> to vector<32x128xbf16>
    %c0_11 = arith.constant 0 : index
    %c0_12 = arith.constant 0 : index
    %24 = vector.load %arg4[%c0_11, %c0_12] : memref<128x64xbf16, #tpu.memory_space<vmem>>, vector<128x64xbf16>
    %cst_13 = arith.constant dense<0.000000e+00> : vector<32x64xf32>
    %25 = tpu.matmul %23, %24, %cst_13 {dimension_numbers = #tpu.dot_dimension_numbers<[1], [0], [0], [1], [0, 0, 1, 1], [], []>} : vector<32x128xbf16>, vector<128x64xbf16>, vector<32x64xf32> -> vector<32x64xf32>
    %c0_14 = arith.constant 0 : index
    %c0_15 = arith.constant 0 : index
    %26 = vector.load %arg5[%c0_14, %c0_15] : memref<128x64xbf16, #tpu.memory_space<vmem>>, vector<128x64xbf16>
    %cst_16 = arith.constant dense<0.000000e+00> : vector<32x64xf32>
    %27 = tpu.matmul %23, %26, %cst_16 {dimension_numbers = #tpu.dot_dimension_numbers<[1], [0], [0], [1], [0, 0, 1, 1], [], []>} : vector<32x128xbf16>, vector<128x64xbf16>, vector<32x64xf32> -> vector<32x64xf32>
    %28 = vector.extract_strided_slice %25 {offsets = [0, 0], sizes = [16, 64], strides = [1, 1]} : vector<32x64xf32> to vector<16x64xf32>
    %29 = vector.extract_strided_slice %27 {offsets = [16, 0], sizes = [16, 64], strides = [1, 1]} : vector<32x64xf32> to vector<16x64xf32>
    %30 = arith.subf %28, %29 : vector<16x64xf32>
    %31 = vector.extract_strided_slice %27 {offsets = [0, 0], sizes = [16, 64], strides = [1, 1]} : vector<32x64xf32> to vector<16x64xf32>
    %32 = vector.extract_strided_slice %25 {offsets = [16, 0], sizes = [16, 64], strides = [1, 1]} : vector<32x64xf32> to vector<16x64xf32>
    %33 = arith.addf %31, %32 : vector<16x64xf32>
    %34 = tpu.concatenate %30, %33 in 0 : vector<16x64xf32>, vector<16x64xf32> -> vector<32x64xf32>
    %35 = arith.truncf %34 : vector<32x64xf32> to vector<32x64xbf16>
    %c0_17 = arith.constant 0 : index
    %c0_18 = arith.constant 0 : index
    %36 = vector.load %arg6[%c0_17, %c0_18] : memref<16x32xbf16, #tpu.memory_space<vmem>>, vector<16x32xbf16>
    %cst_19 = arith.constant dense<0.000000e+00> : vector<16x64xf32>
    %37 = tpu.matmul %36, %35, %cst_19 {dimension_numbers = #tpu.dot_dimension_numbers<[1], [0], [0], [1], [0, 0, 1, 1], [], []>} : vector<16x32xbf16>, vector<32x64xbf16>, vector<16x64xf32> -> vector<16x64xf32>
    %c0_20 = arith.constant 0 : index
    %c0_21 = arith.constant 0 : index
    %c0_22 = arith.constant 0 : index
    %38 = vector.load %arg9[%c0_20, %c0_21, %c0_22] : memref<1x16x64xf32, #tpu.memory_space<vmem>>, vector<1x16x64xf32>
    %39 = vector.shape_cast %38 : vector<1x16x64xf32> to vector<16x64xf32>
    %40 = vector.shape_cast %37 : vector<16x64xf32> to vector<1x16x64xf32>
    tpu.vector_store %arg9[%c0_20, %c0_21, %c0_22], %40 {strides = array<i32>} : memref<1x16x64xf32, #tpu.memory_space<vmem>>, vector<1x16x64xf32>,
    return
  }
  func.func @transform_0(%arg0: i32) -> (i32, i32, i32) {
    %c0_i32 = arith.constant 0 : i32
    %c0_i32_0 = arith.constant 0 : i32
    %c0_i32_1 = arith.constant 0 : i32
    return %arg0, %c0_i32, %c0_i32_0 : i32, i32, i32
  }
  func.func @transform_1(%arg0: i32) -> (i32, i32) {
    %c0_i32 = arith.constant 0 : i32
    %c0_i32_0 = arith.constant 0 : i32
    %c0_i32_1 = arith.constant 0 : i32
    return %c0_i32, %c0_i32_0 : i32, i32
  }
  func.func @transform_2(%arg0: i32) -> (i32, i32) {
    %c0_i32 = arith.constant 0 : i32
    %c0_i32_0 = arith.constant 0 : i32
    %c0_i32_1 = arith.constant 0 : i32
    return %c0_i32, %c0_i32_0 : i32, i32
  }
  func.func @transform_3(%arg0: i32) -> (i32, i32) {
    %c0_i32 = arith.constant 0 : i32
    %c0_i32_0 = arith.constant 0 : i32
    %c0_i32_1 = arith.constant 0 : i32
    return %c0_i32, %c0_i32_0 : i32, i32
  }
  func.func @transform_4(%arg0: i32) -> (i32, i32) {
    %c0_i32 = arith.constant 0 : i32
    %c0_i32_0 = arith.constant 0 : i32
    %c0_i32_1 = arith.constant 0 : i32
    return %c0_i32, %c0_i32_0 : i32, i32
  }
  func.func @transform_5(%arg0: i32) -> (i32, i32) {
    %c0_i32 = arith.constant 0 : i32
    %c0_i32_0 = arith.constant 0 : i32
    %c0_i32_1 = arith.constant 0 : i32
    return %c0_i32, %c0_i32_0 : i32, i32
  }
  func.func @transform_6(%arg0: i32) -> (i32, i32) {
    %c0_i32 = arith.constant 0 : i32
    %c0_i32_0 = arith.constant 0 : i32
    %c0_i32_1 = arith.constant 0 : i32
    return %c0_i32, %c0_i32_0 : i32, i32
  }
  func.func @transform_7(%arg0: i32) -> (i32, i32) {
    %c0_i32 = arith.constant 0 : i32
    %c0_i32_0 = arith.constant 0 : i32
    %c0_i32_1 = arith.constant 0 : i32
    return %c0_i32, %c0_i32_0 : i32, i32
  }
  func.func @transform_8(%arg0: i32) -> (i32, i32, i32) {
    %c0_i32 = arith.constant 0 : i32
    %c0_i32_0 = arith.constant 0 : i32
    %c0_i32_1 = arith.constant 0 : i32
    return %arg0, %c0_i32, %c0_i32_0 : i32, i32, i32
  }
}

</mosaic_0001>

<bundles_post_ra>
// kernel: tpu_custom_call.1
= control target key start
LH: loop header
LB: loop body
LE: loop exit
PB: predicated region body
PF: predicated region fallthrough
CT: control target
= control target key end

     0   :  { %13 = vsyncpa [#allocation3], 0  ;;  %s1387_s0 = inlined_call_operand.vmem [shape: f32[2,16,64], index: 0, kind: input, shape index: {}]   ;;  %s1388_s1 = inlined_call_operand.vmem [shape: bf16[32,16], index: 1, kind: input, shape index: {}]   ;;  %s1389_s2 = inlined_call_operand.vmem [shape: bf16[64,256], index: 2, kind: input, shape index: {}]   ;;  %s1390_s3 = inlined_call_operand.vmem [shape: bf16[128,64], index: 3, kind: input, shape index: {}]   ;;  %s1391_s4 = inlined_call_operand.vmem [shape: bf16[128,64], index: 4, kind: input, shape index: {}]   ;;  %s1392_s5 = inlined_call_operand.vmem [shape: bf16[16,32], index: 5, kind: input, shape index: {}]   ;;  %s1393_s6 = inlined_call_operand.vmem [shape: f32[16,128], index: 6, kind: input, shape index: {}]   ;;  %s1394_s7 = inlined_call_operand.vmem [shape: f32[16,128], index: 7, kind: input, shape index: {}]   ;;  %s1395_s8 = inlined_call_operand.hbm [shape: f32[2,16,64], index: 8, kind: output, shape index: {}]  }
   0x1   :  { %15 = vsyncpa [#allocation3 + $0x1], 0  ;;  %s1186_s27 = smov 0   ;;  %s1188_s28 = smov 0  }
   0x2   :  { %s1190_s29 = smov 0   ;;  %s1192_s30 = smov 0  }
   0x3 LB: > { %s1207_s9 = sadd.s32 4294967295, %s1133_s30   ;;  %s872_s10 = sadd.s32 4294967294, %s1133_s30   ;;  %s1133_s30 = sphi %s1192_s30, %s1401_s30   ;;  %s1129_s29 = sphi %s1190_s29, %s1400_s29   ;;  %s1125_s28 = sphi %s1188_s28, %s1399_s28   ;;  %s1121_s27 = sphi %s1186_s27, %s1398_s27  }
   0x4   : > { %s1211_s11 = sadd.s32 1, %s1133_s30   ;;  %s201_s12 = sadd.s32 1, %s1129_s29 }
   0x5   : > { %s198_s13 = ssub.s32 %s1133_s30, %s1211_s11  ;;  %p211_p0 = scmp.ne.s32.totalorder %s1129_s29, %s1125_s28 }
   0x6   : > { %p199_p1 = scmp.eq.s32.totalorder %s198_s13, 0  ;;  %p212_p2 = scmp.eq.s32.totalorder %s1207_s9, 1 }
   0x7   : > { %p217_p3 = scmp.ne.s32.totalorder %s1125_s28, %s1121_s27  ;;  %p218_p4 = scmp.eq.s32.totalorder %s872_s10, 1 }
   0x8   : > { %s1222_s14 = scalar_select %p199_p1, %s1129_s29, %s201_s12  }
   0x9   : > { %p1224_p5 = por %p212_p2, %p211_p0  ;;  %p1228_p6 = por %p218_p4, %p217_p3 }
   0xa   : > { %p875_p7 = scmp.ge.s32.totalorder %s1133_s30, 1  ;;  %p265_p8 = scmp.lt.s32.totalorder %s1133_s30, 3 }
   0xc   : > { %p266_p9 = pnand %p875_p7, %p265_p8 }
   0xd   : > { %p299_p10 = scmp.lt.s32.totalorder (!%p266_p9), %s1207_s9, 1  ;;  %s296_s20 = sand.u32 (!%p266_p9), 1, %s1125_s28  }
   0xe   : > { %269 = sbr.rel (%p266_p9) target bundleno = 869 (0x365), region = 52  ;;  %s917_s23 = sshll.u32 (!%p266_p9), %s1207_s9, 8 }
   0xf   : > { %s1344_s26 = scalar_lea.hbm (!%p266_p9), %s1395_s8, %s917_s23  ;;  %s1347_s10 = scalar_lea.sflag (!%p266_p9), [#allocation3], %s296_s20 }
  0x10   : > { %s1138_s12 = smov (!%p266_p9), [#allocation2]  }
  0x11   : > { %s1077_s13 = sshll.u32 (!%p266_p9), %s1138_s12, 4  ;;  %s1078_s13 = int_to_ptr.vmem [resolvable:$false] %s1077_s13 }
  0x12   : > { %s1079_s17 = scalar_lea.vmem (!%p266_p9), %s1078_s13, 512 }
  0x13   : > { %v1042_v0 = vld [vmem:[%s1388_s1] sm:$0xff]   ;;  %vm322_vm0 = vcmask 130048   ;;  %s300_s19 = scalar_select %p299_p10, %s1207_s9, 1  ;;  %v1044_v1 = vld [vmem:[%s1389_s2 + $0x34] ss:$8 sps:$4 sm:$0xff]   ;;  %v1043_v8 = vld [vmem:[%s1388_s1 + $0x8] sm:$0xff]  }
  0x14   : > { %946 = vmatprep.mubr.msk.bf16.mxu0 %vm322_vm0, %v1042_v0  ;;  %v1046_v2 = vld [vmem:[%s1389_s2 + $0x30] ss:$8 sps:$4 sm:$0xff]   ;;  %443 = vmatprep.subr.bf16.mxu1 %v1044_v1  ;;  %v1047_v3 = vld [vmem:[%s1389_s2 + $0x24] ss:$8 sps:$4 sm:$0xff]   ;;  %v1049_v4 = vld [vmem:[%s1389_s2 + $0x20] ss:$8 sps:$4 sm:$0xff]  }
  0x15   : > { %s916_s24 = sshll.u32 %s300_s19, 4  ;;  %444 = vmatpush1.bf16.msra.mxu1 %v1046_v2  ;;  %v1050_v9 = vld [vmem:[%s1389_s2 + $0x14] ss:$8 sps:$4 sm:$0xff]   ;;  %v1052_v10 = vld [vmem:[%s1389_s2 + $0x10] ss:$8 sps:$4 sm:$0xff]   ;;  %v1135_v13 = vmov 0  }
  0x16   : > { %s303_s18 = scalar_lea.vmem %s1387_s0, %s916_s24  ;;  %445 = vmatprep.subr.bf16.mxu1 %v1047_v3  ;;  %v1053_v11 = vld [vmem:[%s1389_s2 + $0x4] ss:$8 sps:$4 sm:$0xff]   ;;  %v1055_v12 = vld [vmem:[%s1389_s2] ss:$8 sps:$4 sm:$0xff]   ;;  %467 = vmatprep.mubr.bf16.mxu1 %v1135_v13  ;;  %v1056_v14 = vld [vmem:[%s1390_s3 + $0x38] sm:$0xff]   ;;  %vm428_vm1 = vcmask 523264  }
  0x17   : > { %v305_v5 = vld [vmem:[%s303_s18] sm:$0xff]  ;;  %v306_v6 = vld [vmem:[%s303_s18 + $0x8] sm:$0xff]  ;;  %v1057_v15 = vld [vmem:[%s1391_s4 + $0x38] sm:$0xff]   ;;  %v1136_v2 = vmov 0.0   ;;  %vm1137_vm2 = vmmov 0   ;;  %vm749_vm3 = vcmask 261120  }
  0x18   : > { %v307_v7 = vpack.c.bf16 %v306_v6, %v305_v5  ;;  %v1058_v16 = vld [vmem:[%s1390_s3 + $0x30] sm:$0xff]   ;;  %v1060_v24 = vld [vmem:[%s1390_s3 + $0x28] sm:$0xff]   ;;  %v1062_v26 = vld [vmem:[%s1390_s3 + $0x20] sm:$0xff]   ;;  %s876_s19 = sshll.u32 %s296_s20, 4 }
  0x19   : > { %446 = vmatpush1.bf16.msra.mxu1 %v1049_v4  ;;  %v1059_v22 = vld [vmem:[%s1391_s4 + $0x30] sm:$0xff]   ;;  %v1061_v25 = vld [vmem:[%s1391_s4 + $0x28] sm:$0xff]   ;;  %v1063_v27 = vld [vmem:[%s1391_s4 + $0x20] sm:$0xff]   ;;  %s298_s21 = scalar_lea.vmem [#allocation2], %s876_s19 }
  0x1a   : > { %944 = vmatprep.subr.bf16.mxu0 %v307_v7  ;;  %447 = vmatprep.subr.bf16.mxu1 %v1050_v9  ;;  %v1064_v28 = vld [vmem:[%s1390_s3 + $0x18] sm:$0xff]   ;;  %v1066_v30 = vld [vmem:[%s1390_s3 + $0x10] sm:$0xff]   ;;  %v1068_v32 = vld [vmem:[%s1390_s3 + $0x8] sm:$0xff]   ;;  %s810_s22 = sshll.u32 %s298_s21, 4  ;;  %s1339_s22 = int_to_ptr.vmem [resolvable:$true] %s810_s22 }
  0x1b   : > { %945 = vmatpush3.bf16.msra.mxu0 %v307_v7  ;;  %v1065_v29 = vld [vmem:[%s1391_s4 + $0x18] sm:$0xff]   ;;  %v1067_v31 = vld [vmem:[%s1391_s4 + $0x10] sm:$0xff]   ;;  %v1069_v33 = vld [vmem:[%s1391_s4 + $0x8] sm:$0xff]   ;;  %s1073_s9 = scalar_lea.vmem %s1339_s22, 256  ;;  %p1080_p0 = scmp.lt.s32.totalorder %s1339_s22, %s1078_s13 }
  0x1c   : > { %950 = vmatprep.subr.bf16.mxu0 %v1056_v14  ;;  %v1070_v34 = vld [vmem:[%s1390_s3] sm:$0xff]   ;;  %v493_v49 = vld [vmem:[%s1393_s6 + $0x8] sm:$0xff]  ;;  %p1074_p11 = scmp.ne.s32.totalorder %s1339_s22, %s1073_s9  ;;  %p1081_p1 = scmp.lt.s32.totalorder %s1079_s17, %s1073_s9 }
  0x1d   : > { %448 = vmatpush1.bf16.msra.mxu1 %v1052_v10  ;;  %v1071_v35 = vld [vmem:[%s1391_s4] sm:$0xff]   ;;  %v495_v50 = vld [vmem:[%s1394_s7 + $0x8] sm:$0xff] }
  0x1e   : > { %947 = vmatmul.mubr.msk.bf16.vlgmr.msra.gmra.mxu0 %vm322_vm0, %v1043_v8  ;;  %449 = vmatprep.subr.bf16.mxu1 %v1053_v11  ;;  %v492_v45 = vld [vmem:[%s1393_s6] sm:$0xff]  ;;  %p1075_p12 = pnand %p1074_p11, %p1224_p5  ;;  %p1082_p2 = por %p1081_p1, %p1080_p0 }
  0x1f   : > { %951 = vmatpush3.bf16.msra.mxu0 %v1056_v14  ;;  %v494_v46 = vld [vmem:[%s1394_s7] sm:$0xff] }
  0x20   : > { %952 = vmatprep.subr.bf16.mxu0 %v1058_v16  ;;  %p1076_p13 = pneg %p1075_p12 }
  0x21   : > { %450 = vmatpush1.bf16.msra.mxu1 %v1055_v12 }
  0x22   : > { %970 = vmatprep.subr.bf16.mxu1 %v1057_v15  ;;  %p1083_p3 = pnand %p1082_p2, %p1076_p13 }
  0x23   : > { %953 = vmatpush3.bf16.msra.mxu0 %v1058_v16 }
  0x24   : > { %954 = vmatprep.subr.bf16.mxu0 %v1060_v24 }
  0x27   : > { %955 = vmatpush3.bf16.msra.mxu0 %v1060_v24 }
  0x28   : > { %956 = vmatprep.subr.bf16.mxu0 %v1062_v26 }
  0x2b   : > { %957 = vmatpush3.bf16.msra.mxu0 %v1062_v26 }
  0x2c   : > { %958 = vmatprep.subr.bf16.mxu0 %v1064_v28 }
  0x2f   : > { %959 = vmatpush3.bf16.msra.mxu0 %v1064_v28 }
  0x30   : > { %960 = vmatprep.subr.bf16.mxu0 %v1066_v30 }
  0x33   : > { %961 = vmatpush3.bf16.msra.mxu0 %v1066_v30 }
  0x34   : > { %962 = vmatprep.subr.bf16.mxu0 %v1068_v32 }
  0x37   : > { %963 = vmatpush3.bf16.msra.mxu0 %v1068_v32 }
  0x38   : > { %964 = vmatprep.subr.bf16.mxu0 %v1070_v34 }
  0x3b   : > { %965 = vmatpush3.bf16.msra.mxu0 %v1070_v34 }
  0x3c   : > { %990 = vmatprep.subr.bf16.mxu0 %v1136_v2 }
  0xde   : > { %v948_v17 = vpop.f32.mrf.mxu0 }
  0xe0   : > { %v363_v18 = vpop.f32.mrf.mxu0 }
  0xe2   : > { %v949_v19 = vpop.f32.mrf.mxu0 }
  0xe3   : > { %v379_v23 = vpack.c.bf16 %v949_v19, %v948_v17  ;;  %v1072_v17 = vld [vmem:[%s1392_s5] sm:$0xff]  }
  0xe4   : > { %v366_v20 = vpop.f32.mrf.mxu0 }
  0xe5   : > { %v378_v21 = vpack.c.bf16 %v366_v20, %v363_v18 }
  0xe7   : > { %891 = vmatmul.mubr.msk.bf16.vlgmr.msra.gmra.mxu1 %vm428_vm1, %v378_v21 }
  0xe8   : > { %477 = vmatprep.mubr.bf16.mxu1 %v1135_v13  ;;  %971 = vmatpush3.bf16.msra.mxu1 %v1057_v15 }
  0xe9   : > { %972 = vmatprep.subr.bf16.mxu1 %v1059_v22 }
  0xec   : > { %973 = vmatpush3.bf16.msra.mxu1 %v1059_v22 }
  0xed   : > { %974 = vmatprep.subr.bf16.mxu1 %v1061_v25 }
  0xef   : > { %892 = vmatmul.mubr.msk.bf16.gmra.mxu1 %vm428_vm1, %v379_v23 }
  0xf0   : > { %975 = vmatpush3.bf16.msra.mxu1 %v1061_v25 }
  0xf1   : > { %976 = vmatprep.subr.bf16.mxu1 %v1063_v27 }
  0xf4   : > { %977 = vmatpush3.bf16.msra.mxu1 %v1063_v27 }
  0xf5   : > { %978 = vmatprep.subr.bf16.mxu1 %v1065_v29 }
  0xf8   : > { %979 = vmatpush3.bf16.msra.mxu1 %v1065_v29 }
  0xf9   : > { %980 = vmatprep.subr.bf16.mxu1 %v1067_v31 }
  0xfc   : > { %981 = vmatpush3.bf16.msra.mxu1 %v1067_v31 }
  0xfd   : > { %982 = vmatprep.subr.bf16.mxu1 %v1069_v33 }
 0x100   : > { %983 = vmatpush3.bf16.msra.mxu1 %v1069_v33 }
 0x101   : > { %984 = vmatprep.subr.bf16.mxu1 %v1071_v35 }
 0x104   : > { %985 = vmatpush3.bf16.msra.mxu1 %v1071_v35 }
 0x1a7   : > { %v469_v36 = vpop.f32.mrf.mxu1 }
 0x1a9   : > { %v471_v37 = vpop.f32.mrf.mxu1 }
 0x1ab   : > { %v473_v38 = vpop.f32.mrf.mxu1 }
 0x1ad   : > { %v475_v39 = vpop.f32.mrf.mxu1 }
 0x1af   : > { %v479_v40 = vpop.f32.mrf.mxu1 }
 0x1b0   : > { %v490_v44 = vadd.f32 %v479_v40, %v471_v37 }
 0x1b1   : > { %v481_v41 = vpop.f32.mrf.mxu1 }
 0x1b2   : > { %v488_v42 = vsub.f32 %v469_v36, %v481_v41  ;;  %v498_v54 = vmul.f32 %v494_v46, %v490_v44  ;;  %v504_v55 = vmul.f32 %v492_v45, %v490_v44 }
 0x1b3   : > { %v483_v43 = vpop.f32.mrf.mxu1 }
 0x1b4   : > { %v491_v47 = vadd.f32 %v483_v43, %v475_v39  ;;  %v496_v51 = vmul.f32 %v492_v45, %v488_v42  ;;  %v502_v52 = vmul.f32 %v494_v46, %v488_v42 }
 0x1b5   : > { %v485_v48 = vpop.f32.mrf.mxu1 }
 0x1b6   : > { %v489_v53 = vsub.f32 %v473_v38, %v485_v48  ;;  %v499_v56 = vmul.f32 %v495_v50, %v491_v47  ;;  %v505_v57 = vmul.f32 %v493_v49, %v491_v47  ;;  %v500_v60 = vsub.f32 %v496_v51, %v498_v54 }
 0x1b7   : > { %v506_v61 = vadd.f32 %v504_v55, %v502_v52 }
 0x1b8   : > { %v497_v58 = vmul.f32 %v493_v49, %v489_v53  ;;  %v503_v59 = vmul.f32 %v495_v50, %v489_v53 }
 0x1ba   : > { %v501_v62 = vsub.f32 %v497_v58, %v499_v56  ;;  %v507_v63 = vadd.f32 %v505_v57, %v503_v59 }
 0x1bc   : > { %v509_v0 = vpack.c.bf16 %v507_v63, %v506_v61  ;;  %v508_v1 = vpack.c.bf16 %v501_v62, %v500_v60 }
 0x1be   : > { %966 = vmatprep.mubr.bf16.mxu0 %v508_v1  ;;  %986 = vmatprep.mubr.bf16.mxu1 %v508_v1 }
 0x1bf   : > { %967 = vmatmul.mubr.bf16.vlgmr.msra.gmra.mxu0 %v509_v0  ;;  %987 = vmatmul.mubr.bf16.vlgmr.msra.gmra.mxu1 %v509_v0 }
 0x1c0   : > { %994 = vmatprep.mubr.msk.bf16.mxu0 %vm1137_vm2, %v1136_v2 }
 0x27f   : > { %v968_v3 = vpop.f32.mrf.mxu0  ;;  %v988_v4 = vpop.f32.mrf.mxu1 }
 0x281   : > { %v608_v5 = vpop.f32.mrf.mxu0  ;;  %v721_v6 = vpop.f32.mrf.mxu1 }
 0x282   : > { %v738_v11 = vadd.f32 %v968_v3, %v721_v6  ;;  %v736_v15 = vsub.f32 %v608_v5, %v988_v4 }
 0x283   : > { %v969_v7 = vpop.f32.mrf.mxu0  ;;  %v989_v8 = vpop.f32.mrf.mxu1 }
 0x285   : > { %v611_v9 = vpop.f32.mrf.mxu0  ;;  %v724_v10 = vpop.f32.mrf.mxu1 }
 0x286   : > { %v739_v12 = vadd.f32 %v969_v7, %v724_v10  ;;  %v737_v13 = vsub.f32 %v611_v9, %v989_v8 }
 0x288   : > { %v741_v14 = vpack.c.bf16 %v739_v12, %v738_v11  ;;  %v740_v16 = vpack.c.bf16 %v737_v13, %v736_v15 }
 0x28a   : > { %991 = vmatpush3.bf16.msra.mxu0 %v741_v14 }
 0x28b   : > { %992 = vmatprep.subr.bf16.mxu0 %v1136_v2 }
 0x28e   : > { %993 = vmatpush3.bf16.msra.mxu0 %v740_v16 }
 0x291   : > { %995 = vmatmul.mubr.msk.bf16.vlgmr.msra.gmra.mxu0 %vm749_vm3, %v1072_v17 }
 0x351   : > { %v787_v18 = vpop.f32.mrf.mxu0 }
 0x352   : > { %794 = vst.msk [vmem:[%s298_s21] sm:$0xff] %vm428_vm1, %v787_v18 }
 0x353   : > { %v996_v19 = vpop.f32.mrf.mxu0 }
 0x355   : > { %v790_v20 = vpop.f32.mrf.mxu0 }
 0x356   : > { %795 = vst.msk [vmem:[%s298_s21 + $0x8] sm:$0xff] %vm428_vm1, %v790_v20 }
 0x357   : > { %v997_v21 = vpop.f32.mrf.mxu0 }
 0x358   : > { %1086 = shalt.err (!%p1083_p3)
}
 0x359   : > { %s1087_s18 = scalar_lea.hbm %s1344_s26, 256  ;;  %s1091_s21 = scalar_lea.hbm %s1395_s8, 512 }
 0x35a   : > { %p1088_p4 = scmp.ne.s32.totalorder %s1344_s26, %s1087_s18  ;;  %p1092_p9 = scmp.lt.s32.totalorder %s1344_s26, %s1395_s8 }
 0x35b   : > { %p1093_p10 = scmp.lt.s32.totalorder %s1091_s21, %s1087_s18 }
 0x35c   : > { %p1089_p7 = pnand %p1088_p4, %p1224_p5 }
 0x35d   : > { %p1094_p11 = por %p1093_p10, %p1092_p9 }
 0x35e   : > { %p1090_p8 = pneg %p1089_p7 }
 0x360   : > { %p1095_p12 = pnand %p1094_p11, %p1090_p8 }
 0x362   : > { %1098 = shalt.err (!%p1095_p12)
}
 0x363   : > { %s1139_s25 = smov 128   ;;  %s1140_s9 = smov 8  }
 0x364   : > { %998 = dma.vmem_to_hbm [thread:$0]  (%p1224_p5), %s1339_s22, 256, %s1344_s26, %s1347_s10, %s1139_s25, %s1139_s25, %s1140_s9  }
 0x365 PF: > { %p1004_p13 = scmp.ge.s32.totalorder %s1133_s30, 2  ;;  %s825_s12 = sand.u32 1, %s1121_s27  }
 0x366   : > { %s826_s13 = scalar_lea.sflag [#allocation3], %s825_s12 }
 0x367   : > { %p1001_p0 = pnand %p1004_p13, %p1228_p6 }
 0x369   : > { %p1002_p1 = pneg %p1001_p0 }
 0x36b   : > { %1116 = dma.done.wait (%p1002_p1), %s826_s13, 256  }
 0x36c   : > { %1118 = vsyncadd (%p1002_p1), %s826_s13, 4294967040  ;;  %p18_p2 = scmp.ge.s32.totalorder %s1211_s11, 4   ;;  %s1398_s27 = smov %s1125_s28 }
 0x36d   : > { %s1399_s28 = smov %s1129_s29  ;;  %s1400_s29 = smov %s1222_s14 }
 0x36e   : > { %s1401_s30 = smov %s1211_s11  ;;  %20 = sbr.rel (!%p18_p2) target bundleno = 3 (0x3), region = 87 }
 0x373   :  { %831 = vsyncpa [#allocation3], 1 }
 0x374   :  { %833 = vsyncpa [#allocation3 + $0x1], 1 }

</bundles_post_ra>
